<compile_context>
chip_gen: v7x
topology: tpu7x:2x2x1
jax: 0.10.0
libtpu: 0.0.40
codegen_flags: <defaults>
</compile_context>

<pallas_src>
import math
from functools import partial

import numpy as np
import jax
import jax.numpy as jnp
from jax.experimental import pallas as pl
from jax.experimental.pallas import tpu as pltpu

ANCHOR_GAIN = 2.0  # value implied by the reference code's comments

_INPUT_VMEM_BUDGET = 16 * 1024 * 1024  # bytes for (2 inputs x 2 pipeline buffers)


def _round_up(x, m):
    return (x + m - 1) // m * m


# --------------------------------------------------------------------------------------
# In-kernel math helpers (only ops with guaranteed Mosaic lowerings)
# --------------------------------------------------------------------------------------
def _atan_pos(x):
    """float32-accurate atan for x >= 0 (cephes atanf rational approximation)."""
    t3pi8 = 2.414213562373095   # tan(3*pi/8)
    tpi8 = 0.4142135623730950   # tan(pi/8)
    big = x > t3pi8
    mid = (x > tpi8) & jnp.logical_not(big)
    x_big = -pl.reciprocal(jnp.where(big, x, 1.0), approx=True)
    x_mid = (x - 1.0) * pl.reciprocal(x + 1.0, approx=True)
    y = jnp.where(big, math.pi / 2.0, jnp.where(mid, math.pi / 4.0, 0.0))
    xr = jnp.where(big, x_big, jnp.where(mid, x_mid, x))
    z = xr * xr
    p = ((((8.05374449538e-2 * z - 1.38776856032e-1) * z + 1.99777106478e-1) * z
          - 3.33329491539e-1) * z * xr + xr)
    return y + p


# --------------------------------------------------------------------------------------
# Pallas kernel: per (anchor, row-tile) block of flattened (batch*H*W) cells
# --------------------------------------------------------------------------------------
def _yolo_loss_kernel(anch_ref, pred_ref, tgt_ref, out_ref, *, grid_h, grid_w,
                      num_classes, is_ordinal, tile_rows, total_cells, has_padding):
    a = pl.program_id(0)
    r = pl.program_id(1)
    G = ANCHOR_GAIN
    eps = 1e-7

    pred = pred_ref[0]                      # (F, tile_rows, 128) float32
    tgt = tgt_ref[0]                        # (F, tile_rows, 128)

    # per-anchor scalars straight from SMEM (broadcast happens in-register)
    aw = anch_ref[a, 0] * grid_w
    ah = anch_ref[a, 1] * grid_h

    # ---- decode predicted boxes: sigmoid (EUP exp + approx reciprocal) + anchor decode ----
    sig = pl.reciprocal(1.0 + jnp.exp(-pred[0:4]), approx=True)   # (4, TR, 128)
    px = sig[0] * G - (G - 1.0) * 0.5
    py = sig[1] * G - (G - 1.0) * 0.5
    pw = (sig[2] * G) ** 2 * aw
    ph = (sig[3] * G) ** 2 * ah

    # ---- decode target boxes; positives derived from obj target (builder writes exactly 1.0) ----
    tx = tgt[0]
    ty = tgt[1]
    pos = tgt[4] >= 1.0
    posf = pos.astype(jnp.float32)
    tw = jnp.where(pos, tgt[2] * grid_w, 1.0)   # keep math finite where no target
    th = jnp.where(pos, tgt[3] * grid_h, 1.0)

    # ---- CIoU (cx,cy,w,h boxes) ----
    p_x1 = px - pw * 0.5; p_x2 = px + pw * 0.5
    p_y1 = py - ph * 0.5; p_y2 = py + ph * 0.5
    t_x1 = tx - tw * 0.5; t_x2 = tx + tw * 0.5
    t_y1 = ty - th * 0.5; t_y2 = ty + th * 0.5

    iw = jnp.maximum(jnp.minimum(p_x2, t_x2) - jnp.maximum(p_x1, t_x1), 0.0)
    ih = jnp.maximum(jnp.minimum(p_y2, t_y2) - jnp.maximum(p_y1, t_y1), 0.0)
    inter = iw * ih
    union = pw * ph + tw * th - inter + eps
    iou = inter * pl.reciprocal(union, approx=True)

    cw = jnp.maximum(p_x2, t_x2) - jnp.minimum(p_x1, t_x1)
    ch = jnp.maximum(p_y2, t_y2) - jnp.minimum(p_y1, t_y1)
    c2 = cw * cw + ch * ch + eps
    rho2 = (tx - px) ** 2 + (ty - py) ** 2
    # TODO(synk): custom_yolo_lib BoxLoss(CIoU) internals unavailable; standard CIoU used.
    v = (4.0 / (math.pi ** 2)) * (
        _atan_pos(tw * pl.reciprocal(th + eps, approx=True))
        - _atan_pos(pw * pl.reciprocal(ph + eps, approx=True))) ** 2
    alpha = v * pl.reciprocal(v - iou + (1.0 + eps), approx=True)
    ciou_loss = 1.0 - (iou - (rho2 * pl.reciprocal(c2, approx=True) + v * alpha))

    bbox_lanes = jnp.sum(ciou_loss * posf, axis=0, keepdims=True)   # (1, 128)
    cnt_lanes = jnp.sum(posf, axis=0, keepdims=True)                # (1, 128)

    # ---- fused objectness + class BCE over pred[4:5+nc] ----
    logits = pred[4:5 + num_classes]        # (1+nc, TR, 128)
    labels = tgt[4:5 + num_classes]
    bce = (jnp.maximum(logits, 0.0) - logits * labels
           + jnp.log(1.0 + jnp.exp(-jnp.abs(logits))))

    obj_bce = bce[0]                        # (TR, 128), uses the original obj target
    if has_padding:
        sub = jax.lax.broadcasted_iota(jnp.int32, obj_bce.shape, 0)
        lane = jax.lax.broadcasted_iota(jnp.int32, obj_bce.shape, 1)
        flat = (r * tile_rows + sub) * 128 + lane
        obj_bce = obj_bce * (flat < total_cells).astype(jnp.float32)
    obj_lanes = jnp.sum(obj_bce, axis=0, keepdims=True)             # (1, 128)

    if not is_ordinal:
        # Patch obj target with clamp(iou, 0, 1) at positives.  BCE is linear in the
        # target:  BCE(x, z_new) = BCE(x, z_old) + x * (z_old - z_new), exact.
        # TODO(synk): if a custom VJP is ever added, this IoU must be treated as detached.
        iou_c = jnp.clip(iou, 0.0, 1.0)
        obj_lanes = obj_lanes + jnp.sum(posf * logits[0] * (labels[0] - iou_c),
                                        axis=0, keepdims=True)

    cls_tmp = jnp.sum(bce[1:] * posf, axis=0)                       # (TR, 128)
    cls_lanes = jnp.sum(cls_tmp, axis=0, keepdims=True)             # (1, 128)

    # ---- lane-partial output tile: rows = (bbox, cls, obj, count) ----
    out_ref[0, 0, 0:1, :] = bbox_lanes
    out_ref[0, 0, 1:2, :] = cls_lanes
    out_ref[0, 0, 2:3, :] = obj_lanes
    out_ref[0, 0, 3:4, :] = cnt_lanes


def yolo_loss_pallas(predictions, targets_in_grid, anchors, grid_h, grid_w,
                     num_classes, is_ordinal=False):
    """predictions / targets_in_grid: (B, A, F, H, W) float; anchors: (A, 4)."""
    B, A, F, H, W = predictions.shape
    cells = B * H * W
    rows_raw = (cells + 127) // 128

    # size row tiles so 2 inputs x 2 pipeline buffers fit comfortably in VMEM
    bytes_per_row = 2 * 2 * F * 128 * 4
    cap = max(8, (_INPUT_VMEM_BUDGET // bytes_per_row) // 8 * 8)
    tile_rows = min(cap, _round_up(rows_raw, 8))
    rows_padded = _round_up(rows_raw, tile_rows)
    num_row_tiles = rows_padded // tile_rows
    padded_cells = rows_padded * 128
    has_padding = padded_cells != cells

    def to_kernel_layout(x):
        x = jnp.transpose(x.astype(jnp.float32), (1, 2, 0, 3, 4)).reshape(A, F, cells)
        if has_padding:
            x = jnp.pad(x, ((0, 0), (0, 0), (0, padded_cells - cells)))
        return x.reshape(A, F, rows_padded, 128)

    pred_k = to_kernel_layout(predictions)
    tgt_k = to_kernel_layout(targets_in_grid)
    anchors_wh = jnp.asarray(anchors, jnp.float32)[:, 2:4]          # (A, 2) -> SMEM

    kernel = partial(_yolo_loss_kernel, grid_h=grid_h, grid_w=grid_w,
                     num_classes=num_classes, is_ordinal=is_ordinal,
                     tile_rows=tile_rows, total_cells=cells, has_padding=has_padding)

    out = pl.pallas_call(
        kernel,
        out_shape=jax.ShapeDtypeStruct((A, num_row_tiles, 4, 128), jnp.float32),
        grid=(A, num_row_tiles),
        in_specs=[
            pl.BlockSpec(memory_space=pltpu.MemorySpace.SMEM),                 # anchors
            pl.BlockSpec((1, F, tile_rows, 128), lambda a, r: (a, 0, r, 0)),   # pred
            pl.BlockSpec((1, F, tile_rows, 128), lambda a, r: (a, 0, r, 0)),   # tgt
        ],
        out_specs=pl.BlockSpec((1, 1, 4, 128), lambda a, r: (a, r, 0, 0)),
        compiler_params=pltpu.CompilerParams(
            dimension_semantics=("parallel", "parallel"),
            vmem_limit_bytes=32 * 1024 * 1024),
    )(anchors_wh, pred_k, tgt_k)

    # tiny final reduction / normalization in plain JAX
    partials = out.sum(axis=(1, 3))                                 # (A, 4)
    bbox_sum_a = partials[:, 0]
    cls_sum_a = partials[:, 1]
    obj_sum = partials[:, 2].sum()
    count_a = partials[:, 3]

    safe_cnt = jnp.maximum(count_a, 1.0)
    bbox_loss = jnp.sum(jnp.where(count_a > 0, bbox_sum_a / safe_cnt, 0.0))
    cls_loss = jnp.sum(jnp.where(count_a > 0, cls_sum_a / (safe_cnt * num_classes), 0.0))
    obj_loss = obj_sum / (B * A * H * W)
    total = bbox_loss + obj_loss + cls_loss
    return total, (bbox_loss, obj_loss, cls_loss)


# --------------------------------------------------------------------------------------
# Target building glue (sequential, data-dependent scatter -> plain numpy, not hot path)
# --------------------------------------------------------------------------------------
def build_feature_map_targets_np(ann, anchors, grid_h, grid_w, num_classes, epsilon=1e-4):
    A = anchors.shape[0]
    F = 5 + num_classes
    targets = np.zeros((A, F, grid_h, grid_w), np.float32)
    mask = np.zeros((A, grid_h, grid_w), bool)
    if ann.shape[0] == 0:
        return targets, mask
    bx, by, bw, bh = ann[:, 0], ann[:, 1], ann[:, 2], ann[:, 3]
    cls = ann[:, 4].astype(np.int64)
    aw = anchors[:, 2][None, :]
    ah = anchors[:, 3][None, :]
    bw_e, bh_e = bw[:, None], bh[:, None]
    valid = ((aw * ANCHOR_GAIN ** 2 - epsilon >= bw_e) & (aw / ANCHOR_GAIN ** 2 + epsilon <= bw_e) &
             (ah * ANCHOR_GAIN ** 2 - epsilon >= bh_e) & (ah / ANCHOR_GAIN ** 2 + epsilon <= bh_e))
    ann_idx, anc_idx = np.nonzero(valid)
    for k in range(len(ann_idx)):
        j, a = ann_idx[k], anc_idx[k]
        gx, gy = bx[j] * grid_w, by[j] * grid_h
        gxi, gyi = int(gx), int(gy)
        if targets[a, 4, gyi, gxi] < 1.0:
            targets[a, 0, gyi, gxi] = gx - gxi
            targets[a, 1, gyi, gxi] = gy - gyi
            targets[a, 2, gyi, gxi] = bw[j]
            targets[a, 3, gyi, gxi] = bh[j]
            targets[a, 4, gyi, gxi] = 1.0
            # TODO(synk): is_ordinal_objectness bump path not exercised (flag is False).
            targets[a, 5 + cls[j], gyi, gxi] = 1.0
            mask[a, gyi, gxi] = True
    return targets, mask


def yolo_loss_forward(predictions, targets_batch, anchors, grid_h, grid_w, num_classes):
    tgts = []
    for ann in targets_batch:
        t, _ = build_feature_map_targets_np(np.asarray(ann, np.float32),
                                            np.asarray(anchors, np.float32),
                                            grid_h, grid_w, num_classes)
        tgts.append(t)
    targets_in_grid = jnp.asarray(np.stack(tgts, 0))
    # TODO(synk): _maybe_end_training divergence assertions are training-side checks, skipped.
    return yolo_loss_pallas(predictions, targets_in_grid, anchors,
                            grid_h, grid_w, num_classes)


if __name__ == "__main__":
    num_classes = 8
    num_anchors = 3
    grid_h = grid_w = 16
    batch = 2
    feats = 5 + num_classes

    # deterministic anchors: (A, 4) with (.., .., w, h) normalized
    anchors = np.array([[0.0, 0.0, 0.10, 0.15],
                        [0.0, 0.0, 0.30, 0.25],
                        [0.0, 0.0, 0.60, 0.55]], np.float32)

    key = jax.random.PRNGKey(0)
    predictions = jax.random.normal(
        key, (batch, num_anchors, feats, grid_h, grid_w), dtype=jnp.float32)

    # deterministic annotations: (num_objects, 5) = (x, y, w, h, class_id), all normalized
    targets_batch = [
        np.array([[0.23, 0.37, 0.12, 0.14, 1.0],
                  [0.61, 0.58, 0.33, 0.28, 4.0],
                  [0.80, 0.15, 0.55, 0.60, 7.0]], np.float32),
        np.array([[0.45, 0.72, 0.09, 0.11, 2.0],
                  [0.12, 0.90, 0.26, 0.22, 5.0]], np.float32),
    ]

    total, (bbox_l, obj_l, cls_l) = yolo_loss_forward(
        predictions, targets_batch, anchors, grid_h, grid_w, num_classes)
    jax.block_until_ready(total)
    jax.block_until_ready(bbox_l)
    jax.block_until_ready(obj_l)
    jax.block_until_ready(cls_l)
    print("KERNEL_OK")
</pallas_src>

<mosaic_0001>
module attributes {stable_mosaic.version = 11 : i64} {
  func.func @_yolo_loss_kernel(%arg0: i32, %arg1: i32, %arg2: memref<3x2xf32, #tpu.memory_space<smem>>, %arg3: memref<1x13x8x128xf32, #tpu.memory_space<vmem>>, %arg4: memref<1x13x8x128xf32, #tpu.memory_space<vmem>>, %arg5: memref<1x1x4x128xf32, #tpu.memory_space<vmem>>) attributes {dimension_semantics = [#tpu.dimension_semantics<parallel>, #tpu.dimension_semantics<parallel>], iteration_bounds = array<i64: 3, 1>, scalar_prefetch = 0 : i64, scratch_operands = 0 : i64, tpu.core_type = #tpu.core_type<tc>, window_params = [{transform_indices = @transform_0, window_bounds = array<i64: 3, 2>}, {transform_indices = @transform_1, window_bounds = array<i64: 1, 13, 8, 128>}, {transform_indices = @transform_2, window_bounds = array<i64: 1, 13, 8, 128>}, {transform_indices = @transform_3, window_bounds = array<i64: 1, 1, 4, 128>}]} {
    %c0 = arith.constant 0 : index
    %c0_0 = arith.constant 0 : index
    %c0_1 = arith.constant 0 : index
    %c0_2 = arith.constant 0 : index
    %0 = vector.load %arg3[%c0, %c0_0, %c0_1, %c0_2] : memref<1x13x8x128xf32, #tpu.memory_space<vmem>>, vector<1x13x8x128xf32>
    %1 = vector.shape_cast %0 : vector<1x13x8x128xf32> to vector<13x8x128xf32>
    %c0_3 = arith.constant 0 : index
    %c0_4 = arith.constant 0 : index
    %c0_5 = arith.constant 0 : index
    %c0_6 = arith.constant 0 : index
    %2 = vector.load %arg4[%c0_3, %c0_4, %c0_5, %c0_6] : memref<1x13x8x128xf32, #tpu.memory_space<vmem>>, vector<1x13x8x128xf32>
    %3 = vector.shape_cast %2 : vector<1x13x8x128xf32> to vector<13x8x128xf32>
    %4 = arith.index_cast %arg0 : i32 to index
    %c0_7 = arith.constant 0 : index
    %5 = memref.load %arg2[%4, %c0_7] : memref<3x2xf32, #tpu.memory_space<smem>>
    %cst = arith.constant 1.600000e+01 : f32
    %6 = arith.mulf %5, %cst : f32
    %7 = arith.index_cast %arg0 : i32 to index
    %c1 = arith.constant 1 : index
    %8 = memref.load %arg2[%7, %c1] : memref<3x2xf32, #tpu.memory_space<smem>>
    %cst_8 = arith.constant 1.600000e+01 : f32
    %9 = arith.mulf %8, %cst_8 : f32
    %10 = vector.extract_strided_slice %1 {offsets = [0, 0, 0], sizes = [4, 8, 128], strides = [1, 1, 1]} : vector<13x8x128xf32> to vector<4x8x128xf32>
    %cst_9 = arith.constant 0.000000e+00 : f32
    %11 = vector.broadcast %cst_9 : f32 to vector<4x8x128xf32>
    %12 = arith.subf %11, %10 : vector<4x8x128xf32>
    %13 = math.exp %12 : vector<4x8x128xf32>
    %cst_10 = arith.constant 1.000000e+00 : f32
    %14 = vector.broadcast %cst_10 : f32 to vector<4x8x128xf32>
    %15 = arith.addf %14, %13 : vector<4x8x128xf32>
    %16 = tpu.reciprocal %15 {approx = true} : vector<4x8x128xf32> -> vector<4x8x128xf32>
    %17 = vector.extract_strided_slice %16 {offsets = [0, 0, 0], sizes = [1, 8, 128], strides = [1, 1, 1]} : vector<4x8x128xf32> to vector<1x8x128xf32>
    %18 = vector.shape_cast %17 : vector<1x8x128xf32> to vector<8x128xf32>
    %cst_11 = arith.constant 2.000000e+00 : f32
    %19 = vector.broadcast %cst_11 : f32 to vector<8x128xf32>
    %20 = arith.mulf %18, %19 : vector<8x128xf32>
    %cst_12 = arith.constant 5.000000e-01 : f32
    %21 = vector.broadcast %cst_12 : f32 to vector<8x128xf32>
    %22 = arith.subf %20, %21 : vector<8x128xf32>
    %23 = vector.extract_strided_slice %16 {offsets = [1, 0, 0], sizes = [1, 8, 128], strides = [1, 1, 1]} : vector<4x8x128xf32> to vector<1x8x128xf32>
    %24 = vector.shape_cast %23 : vector<1x8x128xf32> to vector<8x128xf32>
    %cst_13 = arith.constant 2.000000e+00 : f32
    %25 = vector.broadcast %cst_13 : f32 to vector<8x128xf32>
    %26 = arith.mulf %24, %25 : vector<8x128xf32>
    %cst_14 = arith.constant 5.000000e-01 : f32
    %27 = vector.broadcast %cst_14 : f32 to vector<8x128xf32>
    %28 = arith.subf %26, %27 : vector<8x128xf32>
    %29 = vector.extract_strided_slice %16 {offsets = [2, 0, 0], sizes = [1, 8, 128], strides = [1, 1, 1]} : vector<4x8x128xf32> to vector<1x8x128xf32>
    %30 = vector.shape_cast %29 : vector<1x8x128xf32> to vector<8x128xf32>
    %cst_15 = arith.constant 2.000000e+00 : f32
    %31 = vector.broadcast %cst_15 : f32 to vector<8x128xf32>
    %32 = arith.mulf %30, %31 : vector<8x128xf32>
    %33 = arith.mulf %32, %32 : vector<8x128xf32>
    %34 = vector.broadcast %6 : f32 to vector<8x128xf32>
    %35 = arith.mulf %33, %34 : vector<8x128xf32>
    %36 = vector.extract_strided_slice %16 {offsets = [3, 0, 0], sizes = [1, 8, 128], strides = [1, 1, 1]} : vector<4x8x128xf32> to vector<1x8x128xf32>
    %37 = vector.shape_cast %36 : vector<1x8x128xf32> to vector<8x128xf32>
    %cst_16 = arith.constant 2.000000e+00 : f32
    %38 = vector.broadcast %cst_16 : f32 to vector<8x128xf32>
    %39 = arith.mulf %37, %38 : vector<8x128xf32>
    %40 = arith.mulf %39, %39 : vector<8x128xf32>
    %41 = vector.broadcast %9 : f32 to vector<8x128xf32>
    %42 = arith.mulf %40, %41 : vector<8x128xf32>
    %43 = vector.extract_strided_slice %3 {offsets = [0, 0, 0], sizes = [1, 8, 128], strides = [1, 1, 1]} : vector<13x8x128xf32> to vector<1x8x128xf32>
    %44 = vector.shape_cast %43 : vector<1x8x128xf32> to vector<8x128xf32>
    %45 = vector.extract_strided_slice %3 {offsets = [1, 0, 0], sizes = [1, 8, 128], strides = [1, 1, 1]} : vector<13x8x128xf32> to vector<1x8x128xf32>
    %46 = vector.shape_cast %45 : vector<1x8x128xf32> to vector<8x128xf32>
    %47 = vector.extract_strided_slice %3 {offsets = [4, 0, 0], sizes = [1, 8, 128], strides = [1, 1, 1]} : vector<13x8x128xf32> to vector<1x8x128xf32>
    %48 = vector.shape_cast %47 : vector<1x8x128xf32> to vector<8x128xf32>
    %cst_17 = arith.constant 1.000000e+00 : f32
    %49 = vector.broadcast %cst_17 : f32 to vector<8x128xf32>
    %50 = arith.cmpf oge, %48, %49 : vector<8x128xf32>
    %51 = arith.extui %50 : vector<8x128xi1> to vector<8x128xi32>
    %52 = arith.sitofp %51 : vector<8x128xi32> to vector<8x128xf32>
    %53 = vector.extract_strided_slice %3 {offsets = [2, 0, 0], sizes = [1, 8, 128], strides = [1, 1, 1]} : vector<13x8x128xf32> to vector<1x8x128xf32>
    %54 = vector.shape_cast %53 : vector<1x8x128xf32> to vector<8x128xf32>
    %cst_18 = arith.constant 1.600000e+01 : f32
    %55 = vector.broadcast %cst_18 : f32 to vector<8x128xf32>
    %56 = arith.mulf %54, %55 : vector<8x128xf32>
    %cst_19 = arith.constant 1.000000e+00 : f32
    %57 = vector.broadcast %cst_19 : f32 to vector<8x128xf32>
    %58 = arith.select %50, %56, %57 : vector<8x128xi1>, vector<8x128xf32>
    %59 = vector.extract_strided_slice %3 {offsets = [3, 0, 0], sizes = [1, 8, 128], strides = [1, 1, 1]} : vector<13x8x128xf32> to vector<1x8x128xf32>
    %60 = vector.shape_cast %59 : vector<1x8x128xf32> to vector<8x128xf32>
    %cst_20 = arith.constant 1.600000e+01 : f32
    %61 = vector.broadcast %cst_20 : f32 to vector<8x128xf32>
    %62 = arith.mulf %60, %61 : vector<8x128xf32>
    %cst_21 = arith.constant 1.000000e+00 : f32
    %63 = vector.broadcast %cst_21 : f32 to vector<8x128xf32>
    %64 = arith.select %50, %62, %63 : vector<8x128xi1>, vector<8x128xf32>
    %cst_22 = arith.constant 5.000000e-01 : f32
    %65 = vector.broadcast %cst_22 : f32 to vector<8x128xf32>
    %66 = arith.mulf %35, %65 : vector<8x128xf32>
    %67 = arith.subf %22, %66 : vector<8x128xf32>
    %cst_23 = arith.constant 5.000000e-01 : f32
    %68 = vector.broadcast %cst_23 : f32 to vector<8x128xf32>
    %69 = arith.mulf %35, %68 : vector<8x128xf32>
    %70 = arith.addf %22, %69 : vector<8x128xf32>
    %cst_24 = arith.constant 5.000000e-01 : f32
    %71 = vector.broadcast %cst_24 : f32 to vector<8x128xf32>
    %72 = arith.mulf %42, %71 : vector<8x128xf32>
    %73 = arith.subf %28, %72 : vector<8x128xf32>
    %cst_25 = arith.constant 5.000000e-01 : f32
    %74 = vector.broadcast %cst_25 : f32 to vector<8x128xf32>
    %75 = arith.mulf %42, %74 : vector<8x128xf32>
    %76 = arith.addf %28, %75 : vector<8x128xf32>
    %cst_26 = arith.constant 5.000000e-01 : f32
    %77 = vector.broadcast %cst_26 : f32 to vector<8x128xf32>
    %78 = arith.mulf %58, %77 : vector<8x128xf32>
    %79 = arith.subf %44, %78 : vector<8x128xf32>
    %cst_27 = arith.constant 5.000000e-01 : f32
    %80 = vector.broadcast %cst_27 : f32 to vector<8x128xf32>
    %81 = arith.mulf %58, %80 : vector<8x128xf32>
    %82 = arith.addf %44, %81 : vector<8x128xf32>
    %cst_28 = arith.constant 5.000000e-01 : f32
    %83 = vector.broadcast %cst_28 : f32 to vector<8x128xf32>
    %84 = arith.mulf %64, %83 : vector<8x128xf32>
    %85 = arith.subf %46, %84 : vector<8x128xf32>
    %cst_29 = arith.constant 5.000000e-01 : f32
    %86 = vector.broadcast %cst_29 : f32 to vector<8x128xf32>
    %87 = arith.mulf %64, %86 : vector<8x128xf32>
    %88 = arith.addf %46, %87 : vector<8x128xf32>
    %89 = arith.minimumf %70, %82 : vector<8x128xf32>
    %90 = arith.maximumf %67, %79 : vector<8x128xf32>
    %91 = arith.subf %89, %90 : vector<8x128xf32>
    %cst_30 = arith.constant 0.000000e+00 : f32
    %92 = vector.broadcast %cst_30 : f32 to vector<8x128xf32>
    %93 = arith.maximumf %91, %92 : vector<8x128xf32>
    %94 = arith.minimumf %76, %88 : vector<8x128xf32>
    %95 = arith.maximumf %73, %85 : vector<8x128xf32>
    %96 = arith.subf %94, %95 : vector<8x128xf32>
    %cst_31 = arith.constant 0.000000e+00 : f32
    %97 = vector.broadcast %cst_31 : f32 to vector<8x128xf32>
    %98 = arith.maximumf %96, %97 : vector<8x128xf32>
    %99 = arith.mulf %93, %98 : vector<8x128xf32>
    %100 = arith.mulf %35, %42 : vector<8x128xf32>
    %101 = arith.mulf %58, %64 : vector<8x128xf32>
    %102 = arith.addf %100, %101 : vector<8x128xf32>
    %103 = arith.subf %102, %99 : vector<8x128xf32>
    %cst_32 = arith.constant 1.000000e-07 : f32
    %104 = vector.broadcast %cst_32 : f32 to vector<8x128xf32>
    %105 = arith.addf %103, %104 : vector<8x128xf32>
    %106 = tpu.reciprocal %105 {approx = true} : vector<8x128xf32> -> vector<8x128xf32>
    %107 = arith.mulf %99, %106 : vector<8x128xf32>
    %108 = arith.maximumf %70, %82 : vector<8x128xf32>
    %109 = arith.minimumf %67, %79 : vector<8x128xf32>
    %110 = arith.subf %108, %109 : vector<8x128xf32>
    %111 = arith.maximumf %76, %88 : vector<8x128xf32>
    %112 = arith.minimumf %73, %85 : vector<8x128xf32>
    %113 = arith.subf %111, %112 : vector<8x128xf32>
    %114 = arith.mulf %110, %110 : vector<8x128xf32>
    %115 = arith.mulf %113, %113 : vector<8x128xf32>
    %116 = arith.addf %114, %115 : vector<8x128xf32>
    %cst_33 = arith.constant 1.000000e-07 : f32
    %117 = vector.broadcast %cst_33 : f32 to vector<8x128xf32>
    %118 = arith.addf %116, %117 : vector<8x128xf32>
    %119 = arith.subf %44, %22 : vector<8x128xf32>
    %120 = arith.mulf %119, %119 : vector<8x128xf32>
    %121 = arith.subf %46, %28 : vector<8x128xf32>
    %122 = arith.mulf %121, %121 : vector<8x128xf32>
    %123 = arith.addf %120, %122 : vector<8x128xf32>
    %cst_34 = arith.constant 1.000000e-07 : f32
    %124 = vector.broadcast %cst_34 : f32 to vector<8x128xf32>
    %125 = arith.addf %64, %124 : vector<8x128xf32>
    %126 = tpu.reciprocal %125 {approx = true} : vector<8x128xf32> -> vector<8x128xf32>
    %127 = arith.mulf %58, %126 : vector<8x128xf32>
    %cst_35 = arith.constant 2.41421366 : f32
    %128 = vector.broadcast %cst_35 : f32 to vector<8x128xf32>
    %129 = arith.cmpf ogt, %127, %128 : vector<8x128xf32>
    %cst_36 = arith.constant 0.414213568 : f32
    %130 = vector.broadcast %cst_36 : f32 to vector<8x128xf32>
    %131 = arith.cmpf ogt, %127, %130 : vector<8x128xf32>
    %cst_37 = arith.constant dense<true> : vector<8x128xi1>
    %132 = arith.xori %129, %cst_37 : vector<8x128xi1>
    %133 = arith.andi %131, %132 : vector<8x128xi1>
    %cst_38 = arith.constant 1.000000e+00 : f32
    %134 = vector.broadcast %cst_38 : f32 to vector<8x128xf32>
    %135 = arith.select %129, %127, %134 : vector<8x128xi1>, vector<8x128xf32>
    %136 = tpu.reciprocal %135 {approx = true} : vector<8x128xf32> -> vector<8x128xf32>
    %cst_39 = arith.constant 0.000000e+00 : f32
    %137 = vector.broadcast %cst_39 : f32 to vector<8x128xf32>
    %138 = arith.subf %137, %136 : vector<8x128xf32>
    %cst_40 = arith.constant 1.000000e+00 : f32
    %139 = vector.broadcast %cst_40 : f32 to vector<8x128xf32>
    %140 = arith.subf %127, %139 : vector<8x128xf32>
    %cst_41 = arith.constant 1.000000e+00 : f32
    %141 = vector.broadcast %cst_41 : f32 to vector<8x128xf32>
    %142 = arith.addf %127, %141 : vector<8x128xf32>
    %143 = tpu.reciprocal %142 {approx = true} : vector<8x128xf32> -> vector<8x128xf32>
    %144 = arith.mulf %140, %143 : vector<8x128xf32>
    %cst_42 = arith.constant 0.785398185 : f32
    %cst_43 = arith.constant 0.000000e+00 : f32
    %145 = vector.broadcast %cst_42 : f32 to vector<8x128xf32>
    %146 = vector.broadcast %cst_43 : f32 to vector<8x128xf32>
    %147 = arith.select %133, %145, %146 : vector<8x128xi1>, vector<8x128xf32>
    %cst_44 = arith.constant 1.57079637 : f32
    %148 = vector.broadcast %cst_44 : f32 to vector<8x128xf32>
    %149 = arith.select %129, %148, %147 : vector<8x128xi1>, vector<8x128xf32>
    %150 = arith.select %133, %144, %127 : vector<8x128xi1>, vector<8x128xf32>
    %151 = arith.select %129, %138, %150 : vector<8x128xi1>, vector<8x128xf32>
    %152 = arith.mulf %151, %151 : vector<8x128xf32>
    %cst_45 = arith.constant 0.0805374458 : f32
    %153 = vector.broadcast %cst_45 : f32 to vector<8x128xf32>
    %154 = arith.mulf %153, %152 : vector<8x128xf32>
    %cst_46 = arith.constant 0.138776854 : f32
    %155 = vector.broadcast %cst_46 : f32 to vector<8x128xf32>
    %156 = arith.subf %154, %155 : vector<8x128xf32>
    %157 = arith.mulf %156, %152 : vector<8x128xf32>
    %cst_47 = arith.constant 0.199777111 : f32
    %158 = vector.broadcast %cst_47 : f32 to vector<8x128xf32>
    %159 = arith.addf %157, %158 : vector<8x128xf32>
    %160 = arith.mulf %159, %152 : vector<8x128xf32>
    %cst_48 = arith.constant 0.333329499 : f32
    %161 = vector.broadcast %cst_48 : f32 to vector<8x128xf32>
    %162 = arith.subf %160, %161 : vector<8x128xf32>
    %163 = arith.mulf %162, %152 : vector<8x128xf32>
    %164 = arith.mulf %163, %151 : vector<8x128xf32>
    %165 = arith.addf %164, %151 : vector<8x128xf32>
    %166 = arith.addf %149, %165 : vector<8x128xf32>
    %cst_49 = arith.constant 1.000000e-07 : f32
    %167 = vector.broadcast %cst_49 : f32 to vector<8x128xf32>
    %168 = arith.addf %42, %167 : vector<8x128xf32>
    %169 = tpu.reciprocal %168 {approx = true} : vector<8x128xf32> -> vector<8x128xf32>
    %170 = arith.mulf %35, %169 : vector<8x128xf32>
    %cst_50 = arith.constant 2.41421366 : f32
    %171 = vector.broadcast %cst_50 : f32 to vector<8x128xf32>
    %172 = arith.cmpf ogt, %170, %171 : vector<8x128xf32>
    %cst_51 = arith.constant 0.414213568 : f32
    %173 = vector.broadcast %cst_51 : f32 to vector<8x128xf32>
    %174 = arith.cmpf ogt, %170, %173 : vector<8x128xf32>
    %cst_52 = arith.constant dense<true> : vector<8x128xi1>
    %175 = arith.xori %172, %cst_52 : vector<8x128xi1>
    %176 = arith.andi %174, %175 : vector<8x128xi1>
    %cst_53 = arith.constant 1.000000e+00 : f32
    %177 = vector.broadcast %cst_53 : f32 to vector<8x128xf32>
    %178 = arith.select %172, %170, %177 : vector<8x128xi1>, vector<8x128xf32>
    %179 = tpu.reciprocal %178 {approx = true} : vector<8x128xf32> -> vector<8x128xf32>
    %cst_54 = arith.constant 0.000000e+00 : f32
    %180 = vector.broadcast %cst_54 : f32 to vector<8x128xf32>
    %181 = arith.subf %180, %179 : vector<8x128xf32>
    %cst_55 = arith.constant 1.000000e+00 : f32
    %182 = vector.broadcast %cst_55 : f32 to vector<8x128xf32>
    %183 = arith.subf %170, %182 : vector<8x128xf32>
    %cst_56 = arith.constant 1.000000e+00 : f32
    %184 = vector.broadcast %cst_56 : f32 to vector<8x128xf32>
    %185 = arith.addf %170, %184 : vector<8x128xf32>
    %186 = tpu.reciprocal %185 {approx = true} : vector<8x128xf32> -> vector<8x128xf32>
    %187 = arith.mulf %183, %186 : vector<8x128xf32>
    %cst_57 = arith.constant 0.785398185 : f32
    %cst_58 = arith.constant 0.000000e+00 : f32
    %188 = vector.broadcast %cst_57 : f32 to vector<8x128xf32>
    %189 = vector.broadcast %cst_58 : f32 to vector<8x128xf32>
    %190 = arith.select %176, %188, %189 : vector<8x128xi1>, vector<8x128xf32>
    %cst_59 = arith.constant 1.57079637 : f32
    %191 = vector.broadcast %cst_59 : f32 to vector<8x128xf32>
    %192 = arith.select %172, %191, %190 : vector<8x128xi1>, vector<8x128xf32>
    %193 = arith.select %176, %187, %170 : vector<8x128xi1>, vector<8x128xf32>
    %194 = arith.select %172, %181, %193 : vector<8x128xi1>, vector<8x128xf32>
    %195 = arith.mulf %194, %194 : vector<8x128xf32>
    %cst_60 = arith.constant 0.0805374458 : f32
    %196 = vector.broadcast %cst_60 : f32 to vector<8x128xf32>
    %197 = arith.mulf %196, %195 : vector<8x128xf32>
    %cst_61 = arith.constant 0.138776854 : f32
    %198 = vector.broadcast %cst_61 : f32 to vector<8x128xf32>
    %199 = arith.subf %197, %198 : vector<8x128xf32>
    %200 = arith.mulf %199, %195 : vector<8x128xf32>
    %cst_62 = arith.constant 0.199777111 : f32
    %201 = vector.broadcast %cst_62 : f32 to vector<8x128xf32>
    %202 = arith.addf %200, %201 : vector<8x128xf32>
    %203 = arith.mulf %202, %195 : vector<8x128xf32>
    %cst_63 = arith.constant 0.333329499 : f32
    %204 = vector.broadcast %cst_63 : f32 to vector<8x128xf32>
    %205 = arith.subf %203, %204 : vector<8x128xf32>
    %206 = arith.mulf %205, %195 : vector<8x128xf32>
    %207 = arith.mulf %206, %194 : vector<8x128xf32>
    %208 = arith.addf %207, %194 : vector<8x128xf32>
    %209 = arith.addf %192, %208 : vector<8x128xf32>
    %210 = arith.subf %166, %209 : vector<8x128xf32>
    %211 = arith.mulf %210, %210 : vector<8x128xf32>
    %cst_64 = arith.constant 0.405284733 : f32
    %212 = vector.broadcast %cst_64 : f32 to vector<8x128xf32>
    %213 = arith.mulf %212, %211 : vector<8x128xf32>
    %214 = arith.subf %213, %107 : vector<8x128xf32>
    %cst_65 = arith.constant 1.00000012 : f32
    %215 = vector.broadcast %cst_65 : f32 to vector<8x128xf32>
    %216 = arith.addf %214, %215 : vector<8x128xf32>
    %217 = tpu.reciprocal %216 {approx = true} : vector<8x128xf32> -> vector<8x128xf32>
    %218 = arith.mulf %213, %217 : vector<8x128xf32>
    %219 = tpu.reciprocal %118 {approx = true} : vector<8x128xf32> -> vector<8x128xf32>
    %220 = arith.mulf %123, %219 : vector<8x128xf32>
    %221 = arith.mulf %213, %218 : vector<8x128xf32>
    %222 = arith.addf %220, %221 : vector<8x128xf32>
    %223 = arith.subf %107, %222 : vector<8x128xf32>
    %cst_66 = arith.constant 1.000000e+00 : f32
    %224 = vector.broadcast %cst_66 : f32 to vector<8x128xf32>
    %225 = arith.subf %224, %223 : vector<8x128xf32>
    %226 = arith.mulf %225, %52 : vector<8x128xf32>
    %cst_67 = arith.constant dense<0.000000e+00> : vector<128xf32>
    %227 = vector.multi_reduction <add>, %226, %cst_67 [0] : vector<8x128xf32> to vector<128xf32>
    %228 = vector.shape_cast %227 : vector<128xf32> to vector<1x128xf32>
    %cst_68 = arith.constant dense<0.000000e+00> : vector<128xf32>
    %229 = vector.multi_reduction <add>, %52, %cst_68 [0] : vector<8x128xf32> to vector<128xf32>
    %230 = vector.shape_cast %229 : vector<128xf32> to vector<1x128xf32>
    %231 = vector.extract_strided_slice %1 {offsets = [4, 0, 0], sizes = [9, 8, 128], strides = [1, 1, 1]} : vector<13x8x128xf32> to vector<9x8x128xf32>
    %232 = vector.extract_strided_slice %3 {offsets = [4, 0, 0], sizes = [9, 8, 128], strides = [1, 1, 1]} : vector<13x8x128xf32> to vector<9x8x128xf32>
    %cst_69 = arith.constant 0.000000e+00 : f32
    %233 = vector.broadcast %cst_69 : f32 to vector<9x8x128xf32>
    %234 = arith.maximumf %231, %233 : vector<9x8x128xf32>
    %235 = arith.mulf %231, %232 : vector<9x8x128xf32>
    %236 = arith.subf %234, %235 : vector<9x8x128xf32>
    %237 = math.absf %231 : vector<9x8x128xf32>
    %cst_70 = arith.constant 0.000000e+00 : f32
    %238 = vector.broadcast %cst_70 : f32 to vector<9x8x128xf32>
    %239 = arith.subf %238, %237 : vector<9x8x128xf32>
    %240 = math.exp %239 : vector<9x8x128xf32>
    %cst_71 = arith.constant 1.000000e+00 : f32
    %241 = vector.broadcast %cst_71 : f32 to vector<9x8x128xf32>
    %242 = arith.addf %241, %240 : vector<9x8x128xf32>
    %243 = math.log %242 : vector<9x8x128xf32>
    %244 = arith.addf %236, %243 : vector<9x8x128xf32>
    %245 = vector.extract_strided_slice %244 {offsets = [0, 0, 0], sizes = [1, 8, 128], strides = [1, 1, 1]} : vector<9x8x128xf32> to vector<1x8x128xf32>
    %246 = vector.shape_cast %245 : vector<1x8x128xf32> to vector<8x128xf32>
    %247 = tpu.iota {dimensions = array<i32: 0>} : vector<8x128xi32>
    %248 = tpu.iota {dimensions = array<i32: 1>} : vector<8x128xi32>
    %c8_i32 = arith.constant 8 : i32
    %249 = arith.muli %arg1, %c8_i32 : i32
    %250 = vector.broadcast %249 : i32 to vector<8x128xi32>
    %251 = arith.addi %250, %247 : vector<8x128xi32>
    %c128_i32 = arith.constant 128 : i32
    %252 = vector.broadcast %c128_i32 : i32 to vector<8x128xi32>
    %253 = arith.muli %251, %252 : vector<8x128xi32>
    %254 = arith.addi %253, %248 : vector<8x128xi32>
    %c512_i32 = arith.constant 512 : i32
    %255 = vector.broadcast %c512_i32 : i32 to vector<8x128xi32>
    %256 = arith.cmpi slt, %254, %255 : vector<8x128xi32>
    %257 = arith.extui %256 : vector<8x128xi1> to vector<8x128xi32>
    %258 = arith.sitofp %257 : vector<8x128xi32> to vector<8x128xf32>
    %259 = arith.mulf %246, %258 : vector<8x128xf32>
    %cst_72 = arith.constant dense<0.000000e+00> : vector<128xf32>
    %260 = vector.multi_reduction <add>, %259, %cst_72 [0] : vector<8x128xf32> to vector<128xf32>
    %261 = vector.shape_cast %260 : vector<128xf32> to vector<1x128xf32>
    %cst_73 = arith.constant 0.000000e+00 : f32
    %cst_74 = arith.constant 1.000000e+00 : f32
    %262 = vector.broadcast %cst_73 : f32 to vector<8x128xf32>
    %263 = arith.maximumf %262, %107 : vector<8x128xf32>
    %264 = vector.broadcast %cst_74 : f32 to vector<8x128xf32>
    %265 = arith.minimumf %264, %263 : vector<8x128xf32>
    %266 = vector.extract_strided_slice %231 {offsets = [0, 0, 0], sizes = [1, 8, 128], strides = [1, 1, 1]} : vector<9x8x128xf32> to vector<1x8x128xf32>
    %267 = vector.shape_cast %266 : vector<1x8x128xf32> to vector<8x128xf32>
    %268 = arith.mulf %52, %267 : vector<8x128xf32>
    %269 = vector.extract_strided_slice %232 {offsets = [0, 0, 0], sizes = [1, 8, 128], strides = [1, 1, 1]} : vector<9x8x128xf32> to vector<1x8x128xf32>
    %270 = vector.shape_cast %269 : vector<1x8x128xf32> to vector<8x128xf32>
    %271 = arith.subf %270, %265 : vector<8x128xf32>
    %272 = arith.mulf %268, %271 : vector<8x128xf32>
    %cst_75 = arith.constant dense<0.000000e+00> : vector<128xf32>
    %273 = vector.multi_reduction <add>, %272, %cst_75 [0] : vector<8x128xf32> to vector<128xf32>
    %274 = vector.shape_cast %273 : vector<128xf32> to vector<1x128xf32>
    %275 = arith.addf %261, %274 : vector<1x128xf32>
    %276 = vector.extract_strided_slice %244 {offsets = [1, 0, 0], sizes = [8, 8, 128], strides = [1, 1, 1]} : vector<9x8x128xf32> to vector<8x8x128xf32>
    %277 = vector.shape_cast %52 : vector<8x128xf32> to vector<1x8x128xf32>
    %278 = vector.broadcast %277 : vector<1x8x128xf32> to vector<8x8x128xf32>
    %279 = arith.mulf %276, %278 : vector<8x8x128xf32>
    %cst_76 = arith.constant dense<0.000000e+00> : vector<8x128xf32>
    %280 = vector.multi_reduction <add>, %279, %cst_76 [0] : vector<8x8x128xf32> to vector<8x128xf32>
    %cst_77 = arith.constant dense<0.000000e+00> : vector<128xf32>
    %281 = vector.multi_reduction <add>, %280, %cst_77 [0] : vector<8x128xf32> to vector<128xf32>
    %282 = vector.shape_cast %281 : vector<128xf32> to vector<1x128xf32>
    %c0_78 = arith.constant 0 : index
    %c0_79 = arith.constant 0 : index
    %c0_80 = arith.constant 0 : index
    %c0_81 = arith.constant 0 : index
    %283 = vector.load %arg5[%c0_78, %c0_79, %c0_80, %c0_81] : memref<1x1x4x128xf32, #tpu.memory_space<vmem>>, vector<1x1x1x128xf32>
    %284 = vector.shape_cast %283 : vector<1x1x1x128xf32> to vector<1x128xf32>
    %285 = vector.shape_cast %228 : vector<1x128xf32> to vector<1x1x1x128xf32>
    tpu.vector_store %arg5[%c0_78, %c0_79, %c0_80, %c0_81], %285 {strides = array<i32>} : memref<1x1x4x128xf32, #tpu.memory_space<vmem>>, vector<1x1x1x128xf32>,
    %c0_82 = arith.constant 0 : index
    %c0_83 = arith.constant 0 : index
    %c1_84 = arith.constant 1 : index
    %c0_85 = arith.constant 0 : index
    %286 = vector.load %arg5[%c0_82, %c0_83, %c1_84, %c0_85] : memref<1x1x4x128xf32, #tpu.memory_space<vmem>>, vector<1x1x1x128xf32>
    %287 = vector.shape_cast %286 : vector<1x1x1x128xf32> to vector<1x128xf32>
    %288 = vector.shape_cast %282 : vector<1x128xf32> to vector<1x1x1x128xf32>
    tpu.vector_store %arg5[%c0_82, %c0_83, %c1_84, %c0_85], %288 {strides = array<i32>} : memref<1x1x4x128xf32, #tpu.memory_space<vmem>>, vector<1x1x1x128xf32>,
    %c0_86 = arith.constant 0 : index
    %c0_87 = arith.constant 0 : index
    %c2 = arith.constant 2 : index
    %c0_88 = arith.constant 0 : index
    %289 = vector.load %arg5[%c0_86, %c0_87, %c2, %c0_88] : memref<1x1x4x128xf32, #tpu.memory_space<vmem>>, vector<1x1x1x128xf32>
    %290 = vector.shape_cast %289 : vector<1x1x1x128xf32> to vector<1x128xf32>
    %291 = vector.shape_cast %275 : vector<1x128xf32> to vector<1x1x1x128xf32>
    tpu.vector_store %arg5[%c0_86, %c0_87, %c2, %c0_88], %291 {strides = array<i32>} : memref<1x1x4x128xf32, #tpu.memory_space<vmem>>, vector<1x1x1x128xf32>,
    %c0_89 = arith.constant 0 : index
    %c0_90 = arith.constant 0 : index
    %c3 = arith.constant 3 : index
    %c0_91 = arith.constant 0 : index
    %292 = vector.load %arg5[%c0_89, %c0_90, %c3, %c0_91] : memref<1x1x4x128xf32, #tpu.memory_space<vmem>>, vector<1x1x1x128xf32>
    %293 = vector.shape_cast %292 : vector<1x1x1x128xf32> to vector<1x128xf32>
    %294 = vector.shape_cast %230 : vector<1x128xf32> to vector<1x1x1x128xf32>
    tpu.vector_store %arg5[%c0_89, %c0_90, %c3, %c0_91], %294 {strides = array<i32>} : memref<1x1x4x128xf32, #tpu.memory_space<vmem>>, vector<1x1x1x128xf32>,
    return
  }
  func.func @transform_0(%arg0: i32, %arg1: i32) -> (i32, i32) {
    %c0_i32 = arith.constant 0 : i32
    %c0_i32_0 = arith.constant 0 : i32
    %c0_i32_1 = arith.constant 0 : i32
    return %c0_i32, %c0_i32_0 : i32, i32
  }
  func.func @transform_1(%arg0: i32, %arg1: i32) -> (i32, i32, i32, i32) {
    %c0_i32 = arith.constant 0 : i32
    %c0_i32_0 = arith.constant 0 : i32
    %c0_i32_1 = arith.constant 0 : i32
    return %arg0, %c0_i32, %arg1, %c0_i32_0 : i32, i32, i32, i32
  }
  func.func @transform_2(%arg0: i32, %arg1: i32) -> (i32, i32, i32, i32) {
    %c0_i32 = arith.constant 0 : i32
    %c0_i32_0 = arith.constant 0 : i32
    %c0_i32_1 = arith.constant 0 : i32
    return %arg0, %c0_i32, %arg1, %c0_i32_0 : i32, i32, i32, i32
  }
  func.func @transform_3(%arg0: i32, %arg1: i32) -> (i32, i32, i32, i32) {
    %c0_i32 = arith.constant 0 : i32
    %c0_i32_0 = arith.constant 0 : i32
    %c0_i32_1 = arith.constant 0 : i32
    return %arg0, %arg1, %c0_i32, %c0_i32_0 : i32, i32, i32, i32
  }
}

</mosaic_0001>

<bundles_post_ra>
// kernel: tpu_custom_call.1
= control target key start
LH: loop header
LB: loop body
LE: loop exit
PB: predicated region body
PF: predicated region fallthrough
CT: control target
= control target key end

     0   :  { %s1647_s0 = inlined_call_operand.vmem [shape: f32[3,2], index: 0, kind: input, shape index: {}]   ;;  %s1648_s1 = inlined_call_operand.hbm [shape: f32[3,13,8,128], index: 1, kind: input, shape index: {}]   ;;  %s1649_s2 = inlined_call_operand.hbm [shape: f32[3,13,8,128], index: 2, kind: input, shape index: {}]   ;;  %s1650_s3 = inlined_call_operand.hbm [shape: f32[3,1,4,128], index: 3, kind: output, shape index: {}]  }
   0x1   :  { %1655 = sst [smem:[#allocation14_spill]] %s1647_s0 }
   0x2   :  { %1656 = sst [smem:[#allocation15_spill]] %s1648_s1 }
   0x3   :  { %8 = vsyncpa [#allocation5], 0 }
   0x4   :  { %9 = vsyncpa [#allocation3], 0 }
   0x5   :  { %11 = vsyncpa [#allocation3 + $0x1], 0 }
   0x6   :  { %12 = vsyncpa [#allocation8], 0 }
   0x7   :  { %14 = vsyncpa [#allocation8 + $0x1], 0 }
   0x8   :  { %15 = vsyncpa [#allocation4], 0 }
   0x9   :  { %17 = vsyncpa [#allocation4 + $0x1], 0  ;;  %s1126_s12 = smov 0   ;;  %s1128_s13 = smov 0  }
   0xa   :  { %s1130_s14 = smov 0   ;;  %s1132_s15 = smov 0  }
   0xb   :  { %s1134_s16 = smov 0   ;;  %s1136_s17 = smov 0  }
   0xc LB: > { %s749_s18 = sadd.s32 4294967295, %s1096_s17   ;;  %s750_s19 = sadd.s32 4294967294, %s1096_s17   ;;  %s1096_s17 = sphi %s1136_s17, %s23_s17   ;;  %s1092_s16 = sphi %s1134_s16, %s1683_s16   ;;  %s1088_s15 = sphi %s1132_s15, %s1682_s15   ;;  %s1084_s14 = sphi %s1130_s14, %s1681_s14   ;;  %s1080_s13 = sphi %s1128_s13, %s1680_s13   ;;  %s1076_s12 = sphi %s1126_s12, %s1679_s12  }
   0xd   : > { %s65_s20 = sadd.s32 1, %s1084_s14  ;;  %p72_p0 = scmp.ne.s32.totalorder %s1084_s14, %s1080_s13 }
   0xe   : > { %p73_p1 = scmp.eq.s32.totalorder %s1096_s17, 0  ;;  %p78_p2 = scmp.ne.s32.totalorder %s1080_s13, %s1076_s12 }
   0xf   : > { %p1164_p3 = scmp.eq.s32.totalorder %s749_s18, 0  ;;  %p132_p4 = scmp.eq.s32.totalorder %s749_s18, 2 }
  0x10   : > { %p74_p5 = por %p73_p1, %p72_p0  ;;  %p138_p6 = scmp.eq.s32.totalorder %s750_s19, 2 }
  0x11   : > { %s1657_s21 = scalar_select %p1164_p3, 1, 0 }
  0x12   : > { %p1170_p7 = por %p1164_p3, %p78_p2  ;;  %p1174_p8 = por %p132_p4, %p72_p0 }
  0x13   : > { %p1178_p9 = por %p138_p6, %p78_p2  ;;  %p751_p10 = scmp.ge.s32.totalorder %s1096_s17, 1 }
  0x14   : > { %s1658_s22 = scalar_select %p1170_p7, 1, 0 }
  0x15   : > { %s1659_s23 = scalar_select %p1174_p8, 1, 0 }
  0x16   : > { %s1660_s24 = scalar_select %p1178_p9, 1, 0 }
  0x17   : > { %p145_p11 = scmp.lt.s32.totalorder %s1096_s17, 4  ;;  %s1661_s0 = sld [smem:[#allocation14_spill]] }
  0x18   : > { %p805_p13 = scmp.lt.s32.totalorder %s1096_s17, 3  ;;  %s35_s4 = sadd.s32 1, %s1092_s16 }
  0x19   : > { %p1187_p12 = pnand %p751_p10, %p145_p11  ;;  %p1205_p4 = scmp.ge.s32.totalorder %s35_s4, 3 }
  0x1a   : > { %p1194_p1 = pnand %p805_p13, %p74_p5  ;;  %s1210_s6 = sand.u32 1, %s1084_s14  }
  0x1b   : > { %p789_p0 = pneg %p1187_p12 }
  0x1d   : > { %s158_s27 = sshll.u32 %s1661_s0, 4  ;;  %p1200_p2 = pnand %p789_p0, %p1164_p3  ;;  %s159_s27 = int_to_ptr.vmem [resolvable:$true] %s158_s27 }
  0x1e   : > { %s931_s7 = scalar_lea.vmem %s159_s27, 64  ;;  %p939_p13 = scmp.lt.s32.totalorder %s159_s27, %s159_s27 }
  0x1f   : > { %p932_p6 = scmp.ne.s32.totalorder %s159_s27, %s931_s7  ;;  %p933_p5 = pneg %p1200_p2 }
  0x20   : > { %p940_p9 = scmp.lt.s32.totalorder %s931_s7, %s931_s7 }
  0x21   : > { %p934_p10 = pnand %p933_p5, %p932_p6 }
  0x22   : > { %p941_p0 = por %p940_p9, %p939_p13 }
  0x23   : > { %p935_p11 = pneg %p934_p10 }
  0x25   : > { %p942_p8 = pnand %p941_p0, %p935_p11 }
  0x27   : > { %945 = shalt.err (!%p942_p8)
}
  0x28   : > { %s1098_s8 = smov [#allocation2]   ;;  %s1685_s4 = smov (%p1205_p4, %s35_s4), 0 }
  0x29   : > { %792 = dma.vmem_to_smem (!%p1200_p2), %s159_s27, 64, %s1098_s8, [#allocation5]  }
  0x2a   : > { %s774_s9 = smul.u32 104, %s1210_s6  ;;  %s60_s10 = ssub.s32 %s1092_s16, %s1685_s4 }
  0x2b   : > { %s775_s11 = smul.u32 1664, %s1092_s16  ;;  %p63_p8 = scmp.eq.s32.totalorder %s60_s10, 0 }
  0x2c   : > { %s1666_s1 = sld [smem:[#allocation15_spill]]  ;;  %s173_s26 = scalar_lea.vmem [#allocation6], %s774_s9 }
  0x2d   : > { %s181_s27 = sshll.u32 %s173_s26, 4  ;;  %s170_s5 = scalar_lea.sflag [#allocation3], %s1210_s6  ;;  %s1238_s27 = int_to_ptr.vmem [resolvable:$true] %s181_s27 }
  0x2e   : > { %s1236_s30 = scalar_select %p63_p8, %s1084_s14, %s65_s20  }
  0x2f   : > { %p948_p2 = pneg %p1194_p1 }
  0x32   : > { %s1229_s25 = scalar_lea.hbm %s1666_s1, %s775_s11  ;;  %s951_s18 = scalar_lea.hbm %s1666_s1, 4992 }
  0x33   : > { %s946_s7 = scalar_lea.hbm %s1229_s25, 1664  ;;  %p952_p5 = scmp.lt.u32.totalorder %s1229_s25, %s1666_s1 }
  0x34   : > { %p947_p9 = scmp.ne.s32.totalorder %s1229_s25, %s946_s7  ;;  %p953_p10 = scmp.lt.u32.totalorder %s951_s18, %s946_s7 }
  0x35   : > { %p955_p13 = scmp.lt.u32.totalorder %s946_s7, %s1229_s25 }
  0x36   : > { %p949_p4 = pnand %p948_p2, %p947_p9  ;;  %p954_p11 = por %p953_p10, %p952_p5 }
  0x38   : > { %p950_p6 = pneg %p949_p4  ;;  %p956_p0 = por %p955_p13, %p954_p11 }
  0x3a   : > { %p957_p8 = pnand %p956_p0, %p950_p6 }
  0x3c   : > { %960 = shalt.err (!%p957_p8)
}
  0x3d   : > { %s961_s20 = scalar_lea.vmem %s1238_s27, 1664  ;;  %s1099_s8 = smov [#allocation6]  }
  0x3e   : > { %p962_p9 = scmp.ne.s32.totalorder %s1238_s27, %s961_s20  ;;  %s966_s10 = sshll.u32 %s1099_s8, 4  ;;  %s967_s10 = int_to_ptr.vmem [resolvable:$false] %s966_s10 }
  0x3f   : > { %s968_s19 = scalar_lea.vmem %s967_s10, 3328  ;;  %p969_p3 = scmp.lt.s32.totalorder %s1238_s27, %s967_s10 }
  0x40   : > { %p964_p4 = pnand %p962_p9, %p948_p2  ;;  %p970_p5 = scmp.lt.s32.totalorder %s968_s19, %s961_s20 }
  0x42   : > { %p965_p7 = pneg %p964_p4  ;;  %p971_p10 = por %p970_p5, %p969_p3 }
  0x44   : > { %p972_p11 = pnand %p971_p10, %p965_p7 }
  0x46   : > { %975 = shalt.err (!%p972_p11)
}
  0x47   : > { %s1100_s7 = smov 128   ;;  %s1101_s18 = smov 8  }
  0x48   : > { %796 = dma.hbm_to_vmem [thread:$0]  (!%p1194_p1), %s1229_s25, 1664, %s1238_s27, %s170_s5, %s1100_s7, %s1100_s7, %s1101_s18  }
  0x49   : > { %s1276_s8 = scalar_lea.hbm %s1649_s2, %s775_s11  ;;  %s195_s10 = scalar_lea.vmem [#allocation7], %s774_s9 }
  0x4a   : > { %s203_s19 = sshll.u32 %s195_s10, 4  ;;  %s192_s0 = scalar_lea.sflag [#allocation8], %s1210_s6  ;;  %s1280_s19 = int_to_ptr.vmem [resolvable:$true] %s203_s19 }
  0x4b   : > { %s976_s1 = scalar_lea.hbm %s1276_s8, 1664  ;;  %s981_s11 = scalar_lea.hbm %s1649_s2, 4992 }
  0x4c   : > { %p977_p3 = scmp.ne.s32.totalorder %s1276_s8, %s976_s1  ;;  %p982_p13 = scmp.lt.u32.totalorder %s1276_s8, %s1649_s2 }
  0x4d   : > { %p983_p0 = scmp.lt.u32.totalorder %s981_s11, %s976_s1  ;;  %p985_p9 = scmp.lt.u32.totalorder %s976_s1, %s1276_s8 }
  0x4e   : > { %p979_p7 = pnand %p977_p3, %p948_p2 }
  0x4f   : > { %p984_p8 = por %p983_p0, %p982_p13 }
  0x50   : > { %p980_p6 = pneg %p979_p7 }
  0x51   : > { %p986_p4 = por %p985_p9, %p984_p8 }
  0x53   : > { %p987_p5 = pnand %p986_p4, %p980_p6 }
  0x55   : > { %990 = shalt.err (!%p987_p5)
}
  0x56   : > { %s991_s9 = scalar_lea.vmem %s1280_s19, 1664  ;;  %s1102_s20 = smov [#allocation7]  }
  0x57   : > { %p992_p10 = scmp.ne.s32.totalorder %s1280_s19, %s991_s9  ;;  %s996_s10 = sshll.u32 %s1102_s20, 4  ;;  %s997_s10 = int_to_ptr.vmem [resolvable:$false] %s996_s10 }
  0x58   : > { %s998_s25 = scalar_lea.vmem %s997_s10, 3328  ;;  %p999_p7 = scmp.lt.s32.totalorder %s1280_s19, %s997_s10 }
  0x59   : > { %p994_p11 = pnand %p992_p10, %p948_p2  ;;  %p1000_p13 = scmp.lt.s32.totalorder %s998_s25, %s991_s9 }
  0x5b   : > { %p995_p3 = pneg %p994_p11  ;;  %p1001_p0 = por %p1000_p13, %p999_p7 }
  0x5d   : > { %p1002_p8 = pnand %p1001_p0, %p995_p3 }
  0x5f   : > { %1005 = shalt.err (!%p1002_p8)
}
  0x60   : > { %799 = dma.hbm_to_vmem [thread:$0]  (!%p1194_p1), %s1276_s8, 1664, %s1280_s19, %s192_s0, %s1100_s7, %s1100_s7, %s1101_s18  }
  0x61   : > { %215 = sbr.rel (%p1187_p12) target bundleno = 268 (0x10c), region = 32  ;;  %p1667_p2 = scmp.ne.s32.totalorder (!%p1187_p12), %s1657_s21, 0 }
  0x68   : > { %1059 = dma.done.wait (%p1667_p2), [#allocation5], 64  }
  0x69   : > { %1061 = vsyncadd (%p1667_p2), [#allocation5], 4294967232  ;;  %s1318_s1 = sand.u32 1, %s1080_s13   ;;  %p1668_p1 = scmp.ne.s32.totalorder %s1658_s22, 0 }
  0x6a   : > { %s778_s29 = smul.u32 104, %s1318_s1  ;;  %s222_s6 = scalar_lea.sflag [#allocation3], %s1318_s1 }
  0x6c   : > { %s1322_s27 = scalar_lea.vmem [#allocation6], %s778_s29 }
  0x6d   : > { %1063 = dma.done.wait (%p1668_p1), %s222_s6, 1664  }
  0x6e   : > { %1065 = vsyncadd (%p1668_p1), %s222_s6, 4294965632  ;;  %s231_s0 = scalar_lea.sflag [#allocation8], %s1318_s1  ;;  %s1329_s21 = scalar_lea.vmem [#allocation7], %s778_s29 }
  0x6f   : > { %1067 = dma.done.wait (%p1668_p1), %s231_s0, 1664  }
  0x70   : > { %1069 = vsyncadd (%p1668_p1), %s231_s0, 4294965632 }
  0x71   : > { %239 = sfence }
  0x72   : > { %v263_v0 = vld [vmem:[%s1322_s27] sm:$0xff]  ;;  %v264_v1 = vld [vmem:[%s1322_s27 + $0x8] sm:$0xff]  ;;  %v265_v2 = vld [vmem:[%s1322_s27 + $0x10] sm:$0xff]  ;;  %v1103_v14 = vmov 0.0   ;;  %s759_s22 = sshll.u32 %s1088_s15, 7  ;;  %s758_s18 = sshll.u32 %s1318_s1, 2  ;;  %v560_v59 = vlaneseq }
  0x73   : > { %v266_v3 = vld [vmem:[%s1322_s27 + $0x18] sm:$0xff]  ;;  %v295_v4 = vsub.f32 0.0, %v263_v0  ;;  %v296_v5 = vsub.f32 0.0, %v264_v1  ;;  %v297_v6 = vsub.f32 0.0, %v265_v2  ;;  %v279_v9 = vld [vmem:[%s1329_s21 + $0x18] sm:$0xff]  ;;  %v1341_v10 = vld [vmem:[%s1329_s21 + $0x20] sm:$0xff] }
  0x74   : > { %v298_v7 = vsub.f32 0.0, %v266_v3  ;;  %vm327_vm0 = vcmp.ge.f32.partialorder %v1341_v10, 1.0  ;;  %v332_v16 = vmul.f32 16.0, %v279_v9  ;;  %s292_s28 = sadd.s32 1, %s759_s22  ;;  %s1357_s7 = sld [smem:[#allocation2 + %s759_s22]]  ;;  %v278_v22 = vld [vmem:[%s1329_s21 + $0x10] sm:$0xff] }
  0x75   : > { %v299_v8 = vmul.f32 1.442695, %v295_v4  ;;  %v301_v11 = vmul.f32 1.442695, %v296_v5  ;;  %v303_v12 = vmul.f32 1.442695, %v297_v6 }
  0x76   : > { %v305_v13 = vmul.f32 1.442695, %v298_v7  ;;  %v1347_v15 = vsel %vm327_vm0, 1.0, %v1103_v14  ;;  %v1353_v18 = vsel %vm327_vm0, %v332_v16, 1.0  ;;  %s1361_s8 = sld [smem:[#allocation2 + %s292_s28]]  ;;  %v1364_v28 = vld [vmem:[%s1322_s27 + $0x20] sm:$0xff] }
  0x77   : > { %861 = vpow2.f32 %v299_v8  ;;  %v455_v17 = vrot.slane %v1347_v15, 4  ;;  %v377_v19 = vadd.f32 1e-07, %v1353_v18  ;;  %v1367_v29 = vld [vmem:[%s1322_s27 + $0x28] sm:$0xff]  ;;  %v330_v31 = vmul.f32 16.0, %v278_v22  ;;  %v1370_v34 = vld [vmem:[%s1322_s27 + $0x30] sm:$0xff] }
  0x78   : > { %863 = vpow2.f32 %v301_v11  ;;  %v1373_v36 = vld [vmem:[%s1322_s27 + $0x38] sm:$0xff]  ;;  %v488_v39 = vand.u32 2147483647, %v1364_v28  ;;  %v489_v40 = vand.u32 2147483647, %v1367_v29  ;;  %v1378_v41 = vld [vmem:[%s1322_s27 + $0x40] sm:$0xff] }
  0x79   : > { %865 = vpow2.f32 %v303_v12  ;;  %v456_v20 = vadd.f32 %v1347_v15, %v455_v17  ;;  %v1383_v42 = vsel %vm327_vm0, %v330_v31, 1.0  ;;  %v490_v43 = vand.u32 2147483647, %v1370_v34  ;;  %s1386_s11 = scalar_lea.vmem [#allocation9], %s758_s18  ;;  %v1390_v44 = vld [vmem:[%s1322_s27 + $0x48] sm:$0xff]  ;;  %v1396_v49 = vld [vmem:[%s1322_s27 + $0x50] sm:$0xff] }
  0x7a   : > { %867 = vpow2.f32 %v305_v13  ;;  %s291_s19 = smul.f32 16.0, %s1357_s7  ;;  %v491_v45 = vand.u32 2147483647, %v1373_v36  ;;  %v340_v47 = vmul.f32 0.5, %v1383_v42  ;;  %v497_v48 = vsub.f32 0.0, %v488_v39  ;;  %v276_v50 = vld [vmem:[%s1329_s21] sm:$0xff] }
  0x7b   : > { %869 = vrcp.f32 %v377_v19  ;;  %v457_v21 = vrot.slane %v456_v20, 2  ;;  %v492_v52 = vand.u32 2147483647, %v1378_v41  ;;  %v498_v53 = vsub.f32 0.0, %v489_v40  ;;  %v1404_v54 = vld [vmem:[%s1322_s27 + $0x58] sm:$0xff]  ;;  %v1407_v55 = vld [vmem:[%s1322_s27 + $0x60] sm:$0xff] }
  0x7c   : > { %s294_s5 = smul.f32 16.0, %s1361_s8  ;;  %v321_v56 = vstv %s291_s19  ;;  %v493_v57 = vand.u32 2147483647, %v1390_v44  ;;  %v499_v58 = vsub.f32 0.0, %v490_v43  ;;  %v500_v61 = vsub.f32 0.0, %v491_v45  ;;  %s771_s26 = sshll.u32 %s1088_s15, 6 }
  0x7d   : > { %v458_v24 = vadd.f32 %v457_v21, %v456_v20  ;;  %v506_v62 = vmul.f32 1.442695, %v497_v48  ;;  %v1412_v0 = vsub.f32 %v276_v50, %v340_v47  ;;  %v343_v1 = vmul.f32 0.5, %v1353_v18  ;;  %s631_s9 = sshll.u32 %s1386_s11, 4  ;;  %s1598_s25 = scalar_lea.hbm %s1650_s3, %s771_s26  ;;  %s1600_s9 = int_to_ptr.vmem [resolvable:$true] %s631_s9 }
  0x7e   : > { %v325_v63 = vstv %s294_s5  ;;  %v494_v2 = vand.u32 2147483647, %v1396_v49  ;;  %v495_v5 = vand.u32 2147483647, %v1404_v54  ;;  %v501_v6 = vsub.f32 0.0, %v492_v52  ;;  %s617_s29 = scalar_lea.sflag [#allocation4], %s1318_s1 }
  0x7f   : > { %v459_v32 = vrot.slane %v458_v24, 1  ;;  %v508_v7 = vmul.f32 1.442695, %v498_v53  ;;  %v496_v11 = vand.u32 2147483647, %v1407_v55  ;;  %v502_v17 = vsub.f32 0.0, %v493_v57 }
  0x80   : > { %v510_v12 = vmul.f32 1.442695, %v499_v58  ;;  %v512_v19 = vmul.f32 1.442695, %v500_v61  ;;  %v1424_v39 = vadd.f32 %v340_v47, %v276_v50  ;;  %vm1104_vm3 = vmmov 1   ;;  %s1006_s6 = scalar_lea.vmem %s1600_s9, 64 }
  0x81   : > { %v862_v23 = vpop.eup %861  ;;  %v460_v38 = vadd.f32 %v459_v32, %v458_v24  ;;  %v504_v32 = vsub.f32 0.0, %v495_v5  ;;  %v505_v43 = vsub.f32 0.0, %v496_v11  ;;  %p1007_p12 = scmp.ne.s32.totalorder %s1600_s9, %s1006_s6  ;;  %p1677_p6 = scmp.ne.s32.totalorder %s1659_s23, 0 }
  0x82   : > { %v864_v25 = vpop.eup %863  ;;  %v307_v26 = vadd.f32 1.0, %v862_v23  ;;  %v503_v23 = vsub.f32 0.0, %v494_v2  ;;  %s1105_s15 = smov [#allocation9]  }
  0x83   : > { %v866_v27 = vpop.eup %865  ;;  %v308_v30 = vadd.f32 1.0, %v864_v25  ;;  %615 = vst [vmem:[%s1386_s11 + $0x3] sm:$0x1] %v460_v38  ;;  %v520_v58 = vmul.f32 1.442695, %v504_v32  ;;  %p1008_p9 = pnand %p1007_p12, %p1677_p6  ;;  %s1010_s27 = sshll.u32 %s1105_s15, 4  ;;  %s1011_s27 = int_to_ptr.vmem [resolvable:$false] %s1010_s27 }
  0x84   : > { %v868_v33 = vpop.eup %867  ;;  %v309_v35 = vadd.f32 1.0, %v866_v27  ;;  %871 = vrcp.f32 %v307_v26  ;;  %v514_v26 = vmul.f32 1.442695, %v501_v6  ;;  %v277_v27 = vld [vmem:[%s1329_s21 + $0x8] sm:$0xff]  ;;  %v518_v48 = vmul.f32 1.442695, %v503_v23  ;;  %p1013_p5 = scmp.lt.s32.totalorder %s1600_s9, %s1011_s27 }
  0x85   : > { %v310_v37 = vadd.f32 1.0, %v868_v33  ;;  %873 = vrcp.f32 %v308_v30  ;;  %v870_v46 = vpop.eup %869  ;;  %v1427_v53 = vsub.f32 %v277_v27, %v343_v1  ;;  %v1429_v57 = vadd.f32 %v343_v1, %v277_v27  ;;  %p1009_p4 = pneg %p1008_p9  ;;  %s1012_s0 = scalar_lea.vmem %s1011_s27, 128 }
  0x86   : > { %875 = vrcp.f32 %v309_v35  ;;  %v1400_v51 = vmul.f32 %v870_v46, %v1383_v42  ;;  %v522_v5 = vmul.f32 1.442695, %v505_v43  ;;  %v462_v43 = vmax.f32 %v1367_v29, 0.0  ;;  %p1014_p10 = scmp.lt.s32.totalorder %s1012_s0, %s1006_s6 }
  0x87   : > { %877 = vrcp.f32 %v310_v37  ;;  %v516_v37 = vmul.f32 1.442695, %v502_v17 }
  0x88   : > { %vm380_vm1 = vcmp.gt.f32.partialorder %v1400_v51, 2.4142137  ;;  %v388_v60 = vadd.f32 1.0, %v1400_v51  ;;  %vm381_vm2 = vcmp.gt.f32.partialorder %v1400_v51, 0.41421357  ;;  %p1015_p11 = por %p1014_p10, %p1013_p5 }
  0x89   : > { %v384_v4 = vsel %vm380_vm1, %v1400_v51, 1.0  ;;  %vm1446_vm4 = vmxor %vm380_vm1, %vm1104_vm3 }
  0x8a   : > { %879 = vrcp.f32 %v388_v60  ;;  %vm1465_vm5 = vmand %vm381_vm2, %vm1446_vm4  ;;  %p1016_p3 = pnand %p1015_p11, %p1009_p4 }
  0x8b   : > { %881 = vpow2.f32 %v506_v62 }
  0x8c   : > { %883 = vrcp.f32 %v384_v4 }
  0x8d   : > { %885 = vpow2.f32 %v508_v7 }
  0x8e   : > { %v872_v3 = vpop.eup %871  ;;  %887 = vpow2.f32 %v510_v12 }
  0x8f   : > { %v874_v8 = vpop.eup %873  ;;  %v315_v9 = vmul.f32 2.0, %v872_v3  ;;  %889 = vpow2.f32 %v512_v19 }
  0x90   : > { %v876_v13 = vpop.eup %875  ;;  %v317_v16 = vmul.f32 2.0, %v874_v8  ;;  %891 = vpow2.f32 %v514_v26  ;;  %v561_v26 = vshrl.u32 %v560_v59, 7 }
  0x91   : > { %v878_v20 = vpop.eup %877  ;;  %v760_v21 = vadd.f32 -0.5, %v315_v9  ;;  %v319_v22 = vmul.f32 2.0, %v876_v13  ;;  %893 = vpow2.f32 %v516_v37  ;;  %v356_v9 = vmul.f32 %v1353_v18, %v1383_v42  ;;  %v282_v37 = vld [vmem:[%s1329_s21 + $0x30] sm:$0xff] }
  0x92   : > { %v761_v24 = vadd.f32 -0.5, %v317_v16  ;;  %v323_v25 = vmul.f32 2.0, %v878_v20  ;;  %895 = vpow2.f32 %v518_v48 }
  0x93   : > { %v320_v30 = vmul.f32 %v319_v22, %v319_v22  ;;  %v372_v31 = vsub.f32 %v276_v50, %v760_v21  ;;  %897 = vpow2.f32 %v520_v58  ;;  %v563_v58 = vand.u32 127, %v560_v59 }
  0x94   : > { %v324_v33 = vmul.f32 %v323_v25, %v323_v25  ;;  %v374_v35 = vsub.f32 %v277_v27, %v761_v24  ;;  %v880_v47 = vpop.eup %879  ;;  %v464_v59 = vmax.f32 %v1373_v36, 0.0 }
  0x95   : > { %v1422_v38 = vmul.f32 %v321_v56, %v320_v30  ;;  %v373_v40 = vmul.f32 %v372_v31, %v372_v31  ;;  %v763_v56 = vadd.f32 -1.0, %v1400_v51  ;;  %v882_v2 = vpop.eup %881 }
  0x96   : > { %v326_v45 = vmul.f32 %v325_v63, %v324_v33  ;;  %v375_v46 = vmul.f32 %v374_v35, %v374_v35  ;;  %v884_v6 = vpop.eup %883  ;;  %v524_v22 = vadd.f32 1.0, %v882_v2  ;;  %v281_v35 = vld [vmem:[%s1329_s21 + $0x28] sm:$0xff] }
  0x97   : > { %v334_v52 = vmul.f32 0.5, %v1422_v38  ;;  %v886_v11 = vpop.eup %885  ;;  %v390_v17 = vmul.f32 %v880_v47, %v763_v56  ;;  %v567_v47 = vmul.u32 128, %v561_v26  ;;  %v471_v4 = vmul.f32 %v281_v35, %v1367_v29 }
  0x98   : > { %v337_v60 = vmul.f32 0.5, %v326_v45  ;;  %v1431_v61 = vadd.f32 %v375_v46, %v373_v40  ;;  %v406_v63 = vadd.f32 1e-07, %v326_v45  ;;  %v355_v16 = vmul.f32 %v326_v45, %v1422_v38  ;;  %v888_v19 = vpop.eup %887 }
  0x99   : > { %v1434_v50 = vsub.f32 %v760_v21, %v334_v52  ;;  %v1436_v62 = vadd.f32 %v760_v21, %v334_v52  ;;  %v890_v42 = vpop.eup %889  ;;  %v525_v25 = vadd.f32 1.0, %v886_v11  ;;  %v393_v32 = vsel %vm1465_vm5, %v390_v17, %v1400_v51  ;;  %v284_v11 = vld [vmem:[%s1329_s21 + $0x40] sm:$0xff] }
  0x9a   : > { %v1439_v3 = vsub.f32 %v761_v24, %v337_v60  ;;  %v1441_v1 = vadd.f32 %v761_v24, %v337_v60  ;;  %899 = vrcp.f32 %v406_v63  ;;  %v386_v24 = vsub.f32 0.0, %v884_v6  ;;  %v892_v27 = vpop.eup %891 }
  0x9b   : > { %v346_v7 = vmin.f32 %v1436_v62, %v1424_v39  ;;  %v347_v8 = vmax.f32 %v1434_v50, %v1412_v0  ;;  %901 = vpow2.f32 %v522_v5  ;;  %v357_v31 = vadd.f32 %v356_v9, %v355_v16  ;;  %v894_v46 = vpop.eup %893  ;;  %v283_v9 = vld [vmem:[%s1329_s21 + $0x38] sm:$0xff] }
  0x9c   : > { %v350_v12 = vmin.f32 %v1441_v1, %v1429_v57  ;;  %v351_v13 = vmax.f32 %v1439_v3, %v1427_v53  ;;  %v526_v33 = vadd.f32 1.0, %v888_v19  ;;  %v461_v40 = vmax.f32 %v1364_v28, 0.0  ;;  %v896_v63 = vpop.eup %895 }
  0x9d   : > { %v348_v20 = vsub.f32 %v346_v7, %v347_v8  ;;  %v527_v45 = vadd.f32 1.0, %v890_v42  ;;  %v470_v52 = vmul.f32 %v1341_v10, %v1364_v28  ;;  %903 = vlog2.f32 %v524_v22  ;;  %v898_v6 = vpop.eup %897 }
  0x9e   : > { %v352_v21 = vsub.f32 %v350_v12, %v351_v13  ;;  %v1484_v60 = vsel %vm380_vm1, %v386_v24, %v393_v32  ;;  %v528_v56 = vadd.f32 1.0, %v892_v27  ;;  %905 = vlog2.f32 %v525_v25  ;;  %v285_v24 = vld [vmem:[%s1329_s21 + $0x48] sm:$0xff]  ;;  %v286_v25 = vld [vmem:[%s1329_s21 + $0x50] sm:$0xff] }
  0x9f   : > { %v349_v23 = vmax.f32 %v348_v20, 0.0  ;;  %v472_v5 = vmul.f32 %v282_v37, %v1370_v34  ;;  %907 = vlog2.f32 %v526_v33  ;;  %v463_v7 = vmax.f32 %v1370_v34, 0.0  ;;  %v287_v37 = vld [vmem:[%s1329_s21 + $0x58] sm:$0xff] }
  0xa0   : > { %v353_v30 = vmax.f32 %v352_v21, 0.0  ;;  %v529_v8 = vadd.f32 1.0, %v894_v46  ;;  %909 = vlog2.f32 %v527_v45  ;;  %v1495_v13 = vmul.f32 %v1484_v60, %v1484_v60 }
  0xa1   : > { %v465_v29 = vmax.f32 %v1378_v41, 0.0  ;;  %v466_v16 = vmax.f32 %v1390_v44, 0.0  ;;  %v467_v34 = vmax.f32 %v1396_v49, 0.0  ;;  %v530_v19 = vadd.f32 1.0, %v896_v63 }
  0xa2   : > { %v1477_v48 = vmul.f32 %v353_v30, %v349_v23  ;;  %911 = vlog2.f32 %v528_v56  ;;  %v568_v20 = vadd.s32 %v567_v47, %v563_v58  ;;  %v468_v22 = vmax.f32 %v1404_v54, 0.0 }
  0xa3   : > { %v469_v23 = vmax.f32 %v1407_v55, 0.0  ;;  %v473_v26 = vmul.f32 %v283_v9, %v1373_v36  ;;  %v474_v27 = vmul.f32 %v284_v11, %v1378_v41  ;;  %v479_v30 = vsub.f32 %v461_v40, %v470_v52  ;;  %v288_v52 = vld [vmem:[%s1329_s21 + $0x60] sm:$0xff] }
  0xa4   : > { %v358_v2 = vsub.f32 %v357_v31, %v1477_v48  ;;  %v900_v17 = vpop.eup %899  ;;  %v396_v31 = vmul.f32 0.080537446, %v1495_v13  ;;  %v531_v32 = vadd.f32 1.0, %v898_v6  ;;  %vm569_vm7 = vcmp.lt.s32.totalorder %v568_v20, 512 }
  0xa5   : > { %v902_v42 = vpop.eup %901  ;;  %v1501_v21 = vmul.f32 %v900_v17, %v1422_v38  ;;  %v475_v41 = vmul.f32 %v285_v24, %v1390_v44  ;;  %v476_v40 = vmul.f32 %v286_v25, %v1396_v49  ;;  %v480_v45 = vsub.f32 %v462_v43, %v471_v4 }
  0xa6   : > { %v359_v12 = vadd.f32 1e-07, %v358_v2  ;;  %v532_v35 = vadd.f32 1.0, %v902_v42  ;;  %v481_v58 = vsub.f32 %v463_v7, %v472_v5  ;;  %v482_v56 = vsub.f32 %v464_v59, %v473_v26 }
  0xa7   : > { %vm409_vm6 = vcmp.gt.f32.partialorder %v1501_v21, 2.4142137  ;;  %v417_v38 = vadd.f32 1.0, %v1501_v21  ;;  %v904_v36 = vpop.eup %903  ;;  %v764_v2 = vadd.f32 -0.13877685, %v396_v31  ;;  %v477_v11 = vmul.f32 %v287_v37, %v1404_v54 }
  0xa8   : > { %913 = vrcp.f32 %v359_v12  ;;  %v413_v33 = vsel %vm409_vm6, %v1501_v21, 1.0  ;;  %v906_v46 = vpop.eup %905  ;;  %v534_v47 = vmul.f32 0.6931472, %v904_v36  ;;  %v478_v43 = vmul.f32 %v288_v52, %v1407_v55  ;;  %vm1533_vm9 = vmxor %vm409_vm6, %vm1104_vm3 }
  0xa9   : > { %915 = vlog2.f32 %v529_v8  ;;  %v908_v63 = vpop.eup %907  ;;  %v536_v6 = vmul.f32 0.6931472, %v906_v46  ;;  %v769_v8 = vsel %vm569_vm7, 1.0, %v1103_v14  ;;  %v483_v4 = vsub.f32 %v465_v29, %v474_v27 }
  0xaa   : > { %917 = vlog2.f32 %v530_v19  ;;  %v910_v9 = vpop.eup %909  ;;  %v538_v44 = vmul.f32 0.6931472, %v908_v63  ;;  %v551_v49 = vadd.f32 %v534_v47, %v479_v30  ;;  %v484_v59 = vsub.f32 %v466_v16, %v475_v41 }
  0xab   : > { %919 = vrcp.f32 %v413_v33  ;;  %v540_v12 = vmul.f32 0.6931472, %v910_v9  ;;  %v552_v5 = vadd.f32 %v536_v6, %v480_v45  ;;  %v485_v17 = vsub.f32 %v467_v34, %v476_v40 }
  0xac   : > { %921 = vrcp.f32 %v417_v38  ;;  %v912_v7 = vpop.eup %911  ;;  %v553_v19 = vadd.f32 %v538_v44, %v481_v58  ;;  %v572_v42 = vmul.f32 %v769_v8, %v551_v49  ;;  %v398_v20 = vmul.f32 %v764_v2, %v1495_v13 }
  0xad   : > { %923 = vlog2.f32 %v531_v32  ;;  %v542_v25 = vmul.f32 0.6931472, %v912_v7  ;;  %v554_v26 = vadd.f32 %v540_v12, %v482_v56  ;;  %v591_v31 = vmul.f32 %v1347_v15, %v552_v5 }
  0xae   : > { %925 = vlog2.f32 %v532_v35  ;;  %vm410_vm8 = vcmp.gt.f32.partialorder %v1501_v21, 0.41421357  ;;  %v573_v29 = vrot.slane %v572_v42, 4  ;;  %v592_v27 = vmul.f32 %v1347_v15, %v553_v19 }
  0xaf   : > { %v766_v34 = vadd.f32 -1.0, %v1501_v21  ;;  %v555_v33 = vadd.f32 %v542_v25, %v483_v4  ;;  %v593_v35 = vmul.f32 %v1347_v15, %v554_v26  ;;  %v486_v36 = vsub.f32 %v468_v22, %v477_v11  ;;  %vm1547_vm10 = vmand %vm410_vm8, %vm1533_vm9 }
  0xb0   : > { %v574_v37 = vadd.f32 %v573_v29, %v572_v42  ;;  %v599_v40 = vadd.f32 %v592_v27, %v591_v31  ;;  %v399_v46 = vadd.f32 0.19977711, %v398_v20  ;;  %v581_v2 = vmul.f32 %v1347_v15, %v1364_v28 }
  0xb1   : > { %v594_v56 = vmul.f32 %v1347_v15, %v555_v33  ;;  %v487_v11 = vsub.f32 %v469_v23, %v478_v43 }
  0xb2   : > { %v914_v24 = vpop.eup %913  ;;  %v600_v6 = vadd.f32 %v599_v40, %v593_v35  ;;  %v575_v5 = vrot.slane %v574_v37, 2  ;;  %v400_v19 = vmul.f32 %v399_v46, %v1495_v13  ;;  %v363_v46 = vmin.f32 %v1434_v50, %v1412_v0 }
  0xb3   : > { %v916_v38 = vpop.eup %915  ;;  %v1526_v30 = vmul.f32 %v914_v24, %v1477_v48  ;;  %v391_v0 = vsel %vm1465_vm5, 0.7853982, %v1103_v14 }
  0xb4   : > { %v544_v32 = vmul.f32 0.6931472, %v916_v38  ;;  %v918_v48 = vpop.eup %917  ;;  %v576_v26 = vadd.f32 %v575_v5, %v574_v37  ;;  %v765_v38 = vadd.f32 -0.3333295, %v400_v19  ;;  %v362_v37 = vmax.f32 %v1436_v62, %v1424_v39 }
  0xb5   : > { %v579_v41 = vmax.f32 %v1526_v30, 0.0  ;;  %v920_v45 = vpop.eup %919  ;;  %v546_v52 = vmul.f32 0.6931472, %v918_v48 }
  0xb6   : > { %v556_v58 = vadd.f32 %v544_v32, %v484_v59  ;;  %v922_v47 = vpop.eup %921  ;;  %v415_v54 = vsub.f32 0.0, %v920_v45  ;;  %v601_v59 = vadd.f32 %v600_v6, %v594_v56  ;;  %v577_v35 = vrot.slane %v576_v26, 1 }
  0xb7   : > { %v580_v22 = vmin.f32 %v579_v41, 1.0  ;;  %v924_v8 = vpop.eup %923  ;;  %v419_v9 = vmul.f32 %v922_v47, %v766_v34  ;;  %v557_v44 = vadd.f32 %v546_v52, %v485_v17  ;;  %v365_v56 = vmax.f32 %v1441_v1, %v1429_v57 }
  0xb8   : > { %v595_v49 = vmul.f32 %v1347_v15, %v556_v58  ;;  %v926_v4 = vpop.eup %925  ;;  %v548_v12 = vmul.f32 0.6931472, %v924_v8  ;;  %v366_v47 = vmin.f32 %v1439_v3, %v1427_v53  ;;  %v364_v62 = vsub.f32 %v362_v37, %v363_v46 }
  0xb9   : > { %v582_v7 = vsub.f32 %v1341_v10, %v580_v22  ;;  %v422_v28 = vsel %vm1547_vm10, %v419_v9, %v1501_v21  ;;  %v550_v42 = vmul.f32 0.6931472, %v926_v4  ;;  %v596_v24 = vmul.f32 %v1347_v15, %v557_v44 }
  0xba   : > { %v423_v55 = vsel %vm409_vm6, %v415_v54, %v422_v28  ;;  %v558_v23 = vadd.f32 %v548_v12, %v486_v36  ;;  %v602_v25 = vadd.f32 %v601_v59, %v595_v49  ;;  %v402_v36 = vmul.f32 %v765_v38, %v1495_v13 }
  0xbb   : > { %v583_v43 = vmul.f32 %v582_v7, %v581_v2  ;;  %v424_v17 = vmul.f32 %v423_v55, %v423_v55  ;;  %v559_v20 = vadd.f32 %v550_v42, %v487_v11  ;;  %v578_v54 = vadd.f32 %v577_v35, %v576_v26 }
  0xbc   : > { %v597_v31 = vmul.f32 %v1347_v15, %v558_v23  ;;  %v603_v16 = vadd.f32 %v602_v25, %v596_v24  ;;  %v403_v13 = vmul.f32 %v402_v36, %v1484_v60  ;;  %v367_v9 = vsub.f32 %v365_v56, %v366_v47 }
  0xbd   : > { %v584_v10 = vrot.slane %v583_v43, 4  ;;  %v425_v29 = vmul.f32 0.080537446, %v424_v17  ;;  %v598_v27 = vmul.f32 %v1347_v15, %v559_v20  ;;  %v420_v3 = vsel %vm1547_vm10, 0.7853982, %v1103_v14 }
  0xbe   : > { %v604_v33 = vadd.f32 %v603_v16, %v597_v31  ;;  %v404_v53 = vadd.f32 %v403_v13, %v1484_v60  ;;  %v392_v44 = vsel %vm380_vm1, 1.5707964, %v391_v0  ;;  %v368_v4 = vmul.f32 %v364_v62, %v364_v62 }
  0xbf   : > { %v585_v34 = vadd.f32 %v584_v10, %v583_v43  ;;  %v767_v32 = vadd.f32 -0.13877685, %v425_v29  ;;  %v421_v12 = vsel %vm409_vm6, 1.5707964, %v420_v3  ;;  %v369_v5 = vmul.f32 %v367_v9, %v367_v9 }
  0xc0   : > { %v605_v40 = vadd.f32 %v604_v33, %v598_v27  ;;  %v405_v7 = vadd.f32 %v404_v53, %v392_v44 }
  0xc1   : > { %v586_v48 = vrot.slane %v585_v34, 2  ;;  %v427_v41 = vmul.f32 %v767_v32, %v424_v17  ;;  %v370_v63 = vadd.f32 %v369_v5, %v368_v4 }
  0xc2   : > { %v606_v58 = vrot.slane %v605_v40, 4 }
  0xc3   : > { %v587_v45 = vadd.f32 %v586_v48, %v585_v34  ;;  %v428_v52 = vadd.f32 0.19977711, %v427_v41  ;;  %v371_v42 = vadd.f32 1e-07, %v370_v63 }
  0xc4   : > { %v607_v6 = vadd.f32 %v606_v58, %v605_v40 }
  0xc5   : > { %v588_v22 = vrot.slane %v587_v45, 1  ;;  %v429_v2 = vmul.f32 %v428_v52, %v424_v17  ;;  %927 = vrcp.f32 %v371_v42 }
  0xc6   : > { %v608_v50 = vrot.slane %v607_v6, 2 }
  0xc7   : > { %v589_v8 = vadd.f32 %v588_v22, %v587_v45  ;;  %v768_v39 = vadd.f32 -0.3333295, %v429_v2 }
  0xc8   : > { %v609_v11 = vadd.f32 %v608_v50, %v607_v6 }
  0xc9   : > { %v590_v57 = vadd.f32 %v589_v8, %v578_v54  ;;  %v431_v1 = vmul.f32 %v768_v39, %v424_v17 }
  0xca   : > { %v610_v49 = vrot.slane %v609_v11, 1 }
  0xcb   : > { %614 = vst [vmem:[%s1386_s11 + $0x2] sm:$0x1] %v590_v57  ;;  %v432_v18 = vmul.f32 %v431_v1, %v423_v55 }
  0xcc   : > { %v611_v60 = vadd.f32 %v610_v49, %v609_v11 }
  0xcd   : > { %v433_v59 = vadd.f32 %v432_v18, %v423_v55 }
  0xce   : > { %613 = vst [vmem:[%s1386_s11 + $0x1] sm:$0x1] %v611_v60 }
  0xcf   : > { %v434_v19 = vadd.f32 %v433_v59, %v421_v12  ;;  %v928_v21 = vpop.eup %927 }
  0xd0   : > { %v443_v55 = vmul.f32 %v928_v21, %v1431_v61 }
  0xd1   : > { %v435_v14 = vsub.f32 %v405_v7, %v434_v19 }
  0xd3   : > { %v436_v28 = vmul.f32 %v435_v14, %v435_v14 }
  0xd5   : > { %v437_v24 = vmul.f32 0.40528473, %v436_v28 }
  0xd7   : > { %v438_v51 = vsub.f32 %v437_v24, %v1526_v30 }
  0xd9   : > { %v439_v23 = vadd.f32 1.0000001, %v438_v51 }
  0xdb   : > { %929 = vrcp.f32 %v439_v23 }
  0xe5   : > { %v930_v43 = vpop.eup %929 }
  0xe6   : > { %v441_v17 = vmul.f32 %v930_v43, %v437_v24 }
  0xe8   : > { %v444_v20 = vmul.f32 %v441_v17, %v437_v24 }
  0xea   : > { %v445_v25 = vadd.f32 %v444_v20, %v443_v55 }
  0xec   : > { %v446_v26 = vsub.f32 %v1526_v30, %v445_v25 }
  0xee   : > { %v447_v10 = vsub.f32 1.0, %v446_v26 }
  0xf0   : > { %v448_v31 = vmul.f32 %v1347_v15, %v447_v10 }
  0xf2   : > { %v449_v38 = vrot.slane %v448_v31, 4 }
  0xf4   : > { %v450_v29 = vadd.f32 %v449_v38, %v448_v31 }
  0xf6   : > { %v451_v27 = vrot.slane %v450_v29, 2 }
  0xf8   : > { %v452_v16 = vadd.f32 %v451_v27, %v450_v29 }
  0xfa   : > { %v453_v34 = vrot.slane %v452_v16, 1 }
  0xfc   : > { %v454_v32 = vadd.f32 %v453_v34, %v452_v16 }
  0xfe   : > { %612 = vst [vmem:[%s1386_s11] sm:$0x1] %v454_v32 }
  0xff   : > { %1019 = shalt.err (!%p1016_p3)
}
 0x100   : > { %s1020_s1 = scalar_lea.hbm %s1598_s25, 64  ;;  %s1024_s28 = scalar_lea.hbm %s1650_s3, 192 }
 0x101   : > { %p1021_p7 = scmp.ne.s32.totalorder %s1598_s25, %s1020_s1  ;;  %p1025_p8 = scmp.lt.u32.totalorder %s1598_s25, %s1650_s3 }
 0x102   : > { %p1026_p2 = scmp.lt.u32.totalorder %s1024_s28, %s1020_s1  ;;  %p1028_p12 = scmp.lt.u32.totalorder %s1020_s1, %s1598_s25 }
 0x103   : > { %p1022_p13 = pnand %p1021_p7, %p1677_p6 }
 0x104   : > { %p1027_p1 = por %p1026_p2, %p1025_p8 }
 0x105   : > { %p1023_p0 = pneg %p1022_p13 }
 0x106   : > { %p1029_p9 = por %p1028_p12, %p1027_p1 }
 0x108   : > { %p1030_p4 = pnand %p1029_p9, %p1023_p0 }
 0x10a   : > { %1033 = shalt.err (!%p1030_p4)
}
 0x10b   : > { %787 = dma.vmem_to_hbm [thread:$0]  (%p1677_p6), %s1600_s9, 64, %s1598_s25, %s617_s29  }
 0x10c PF: > { %p807_p5 = scmp.ge.s32.totalorder %s1096_s17, 2  ;;  %s643_s8 = sand.u32 1, %s1076_s12  }
 0x10d   : > { %p1678_p10 = scmp.ne.s32.totalorder %s1660_s24, 0  ;;  %s644_s19 = scalar_lea.sflag [#allocation4], %s643_s8 }
 0x10f   : > { %p801_p11 = pnand %p807_p5, %p1678_p10 }
 0x111   : > { %1071 = dma.done.wait (!%p801_p11), %s644_s19, 64  }
 0x112   : > { %1073 = vsyncadd (!%p801_p11), %s644_s19, 4294967232  ;;  %s23_s17 = sadd.s32 1, %s1096_s17   ;;  %s1679_s12 = smov %s1080_s13 }
 0x113   : > { %p20_p3 = scmp.ge.s32.totalorder %s23_s17, 5   ;;  %s1680_s13 = smov %s1084_s14 }
 0x114   : > { %s1681_s14 = smov %s1236_s30  ;;  %s1682_s15 = smov %s1092_s16 }
 0x115   : > { %s1683_s16 = smov %s1685_s4  ;;  %22 = sbr.rel (!%p20_p3) target bundleno = 12 (0xc), region = 95 }
 0x11c   :  { %649 = vsyncpa [#allocation3], 1 }
 0x11d   :  { %651 = vsyncpa [#allocation3 + $0x1], 1 }
 0x11e   :  { %652 = vsyncpa [#allocation8], 1 }
 0x11f   :  { %654 = vsyncpa [#allocation8 + $0x1], 1 }
 0x120   :  { %655 = vsyncpa [#allocation4], 1 }
 0x121   :  { %657 = vsyncpa [#allocation4 + $0x1], 1 }
 0x122   :  { %658 = vsyncpa [#allocation5], 1 }
 0x123   :  { %660 = vsyncpa [#allocation5 + $0x1], 1 }

</bundles_post_ra>
